<compile_context>
chip_gen: v7x
topology: tpu7x:2x2x1
jax: 0.10.0
libtpu: 0.0.40
codegen_flags: <defaults>
</compile_context>

<pallas_src>
import functools
import math

import jax
import jax.numpy as jnp
from jax.experimental import pallas as pl
from jax.experimental.pallas import tpu as pltpu


# ---------------------------------------------------------------------------
# Kernel: out = x + tile(pe, batch)   (pure element-wise add, mem-bound)
# ---------------------------------------------------------------------------
def _pe_add_kernel(pe_ref, x_ref, o_ref, *, batch: int):
    # pe_ref: (seq_tile, D)      float32
    # x_ref / o_ref: (seq_tile, B*D)   x.dtype
    pe = pe_ref[...]                                   # (seq_tile, D) f32
    if batch > 1:
        pe = jnp.tile(pe, (1, batch))                  # (seq_tile, B*D), lane concat (cheap)
    x = x_ref[...].astype(jnp.float32)
    o_ref[...] = (x + pe).astype(o_ref.dtype)


# ---------------------------------------------------------------------------
# Wrapper
# ---------------------------------------------------------------------------
def _build_pe_table(seq_len: int, d_model: int) -> jax.Array:
    """Same construction as the PyTorch buffer, only the first seq_len rows."""
    position = jnp.arange(seq_len, dtype=jnp.float32)[:, None]          # (S, 1)
    div_term = jnp.exp(jnp.arange(0, d_model, 2, dtype=jnp.float32)
                       * (-math.log(10000.0) / d_model))                # (D/2,)
    ang = position * div_term                                           # (S, D/2)
    pe = jnp.zeros((seq_len, d_model), dtype=jnp.float32)
    pe = pe.at[:, 0::2].set(jnp.sin(ang))
    pe = pe.at[:, 1::2].set(jnp.cos(ang))
    return pe


def _choose_seq_tile(seq_len: int, row_bytes: int,
                     target_bytes: int = 4 * 1024 * 1024) -> int:
    """Largest sublane-aligned divisor of seq_len whose block fits the budget.

    Prefers keeping >= 2 grid steps (v7x has 2 TensorCores) when possible.
    Falls back to a single full-extent block if seq_len has no multiple-of-8
    divisor (full extent always satisfies the (8, 128) tiling rule).
    """
    aligned = [t for t in range(8, seq_len + 1, 8) if seq_len % t == 0]
    if not aligned:
        return seq_len
    fitting = [t for t in aligned if t * row_bytes <= target_bytes]
    if not fitting:
        return aligned[0]
    two_step = [t for t in fitting if seq_len // t >= 2]
    return max(two_step) if two_step else max(fitting)


def positional_encoding(x: jax.Array, *, max_len: int = 5000,
                        seq_tile: int | None = None) -> jax.Array:
    """x: (seq_len, batch, d_model) -> x + pe[:seq_len] (broadcast over batch)."""
    S, B, D = x.shape
    assert S <= max_len, "sequence longer than max_len"
    assert D % 2 == 0, "d_model must be even (matches the PyTorch module)"

    pe = _build_pe_table(S, D)                 # (S, D) f32, like the torch buffer
    x2 = x.reshape(S, B * D)                   # contiguous -> free, lane-dense rows

    row_bytes = B * D * x.dtype.itemsize
    if seq_tile is None:
        seq_tile = _choose_seq_tile(S, row_bytes)
    assert S % seq_tile == 0

    grid = (S // seq_tile,)

    out2 = pl.pallas_call(
        functools.partial(_pe_add_kernel, batch=B),
        out_shape=jax.ShapeDtypeStruct((S, B * D), x.dtype),
        grid_spec=pltpu.PrefetchScalarGridSpec(
            num_scalar_prefetch=0,
            grid=grid,
            in_specs=[
                pl.BlockSpec((seq_tile, D), lambda i: (i, 0)),        # pe
                pl.BlockSpec((seq_tile, B * D), lambda i: (i, 0)),    # x (flattened)
            ],
            out_specs=pl.BlockSpec((seq_tile, B * D), lambda i: (i, 0)),
        ),
        compiler_params=pltpu.CompilerParams(
            dimension_semantics=("parallel",),
            vmem_limit_bytes=32 * 1024 * 1024,
        ),
    )(pe, x2)

    return out2.reshape(S, B, D)


# ---------------------------------------------------------------------------
# Pure-JAX reference (reproduces the PyTorch buffer + forward exactly)
# ---------------------------------------------------------------------------
def _reference(x: jax.Array, max_len: int = 5000) -> jax.Array:
    S, B, D = x.shape
    position = jnp.arange(max_len, dtype=jnp.float32)[:, None]
    div_term = jnp.exp(jnp.arange(0, D, 2, dtype=jnp.float32)
                       * (-math.log(10000.0) / D))
    pe = jnp.zeros((max_len, D), dtype=jnp.float32)
    pe = pe.at[:, 0::2].set(jnp.sin(position * div_term))
    pe = pe.at[:, 1::2].set(jnp.cos(position * div_term))
    pe = pe[:, None, :]                        # (max_len, 1, D)
    return x + pe[:S, :]


if __name__ == "__main__":
    key = jax.random.PRNGKey(0)

    # Small shape consistent with the module's (seq, batch, d_model) layout.
    seq, batch, d_model = 8, 2, 32
    x = jax.random.normal(key, (seq, batch, d_model), dtype=jnp.float32)

    out = jax.block_until_ready(positional_encoding(x))
    ref = _reference(x)
    assert out.shape == ref.shape == (seq, batch, d_model)
    assert jnp.allclose(out, ref, atol=1e-5, rtol=1e-5), "mismatch vs reference"

    # Second check exercising a multi-step grid (tile selection picks 16 -> grid=2).
    key2 = jax.random.PRNGKey(1)
    x2 = jax.random.normal(key2, (32, 2, 32), dtype=jnp.float32)
    out2 = jax.block_until_ready(positional_encoding(x2))
    ref2 = _reference(x2)
    assert jnp.allclose(out2, ref2, atol=1e-5, rtol=1e-5), "mismatch vs reference (grid>1)"

    print("KERNEL_OK")
</pallas_src>

<mosaic_0001>
module attributes {stable_mosaic.version = 11 : i64} {
  func.func @_pe_add_kernel(%arg0: i32, %arg1: memref<8x32xf32, #tpu.memory_space<vmem>>, %arg2: memref<8x64xf32, #tpu.memory_space<vmem>>, %arg3: memref<8x64xf32, #tpu.memory_space<vmem>>) attributes {dimension_semantics = [#tpu.dimension_semantics<parallel>], iteration_bounds = array<i64: 1>, scalar_prefetch = 0 : i64, scratch_operands = 0 : i64, tpu.core_type = #tpu.core_type<tc>, window_params = [{transform_indices = @transform_0, window_bounds = array<i64: 8, 32>}, {transform_indices = @transform_1, window_bounds = array<i64: 8, 64>}, {transform_indices = @transform_2, window_bounds = array<i64: 8, 64>}]} {
    %c0 = arith.constant 0 : index
    %c0_0 = arith.constant 0 : index
    %0 = vector.load %arg1[%c0, %c0_0] : memref<8x32xf32, #tpu.memory_space<vmem>>, vector<8x32xf32>
    %1 = tpu.concatenate %0, %0 in 1 : vector<8x32xf32>, vector<8x32xf32> -> vector<8x64xf32>
    %c0_1 = arith.constant 0 : index
    %c0_2 = arith.constant 0 : index
    %2 = vector.load %arg2[%c0_1, %c0_2] : memref<8x64xf32, #tpu.memory_space<vmem>>, vector<8x64xf32>
    %3 = arith.addf %2, %1 : vector<8x64xf32>
    %c0_3 = arith.constant 0 : index
    %c0_4 = arith.constant 0 : index
    %4 = vector.load %arg3[%c0_3, %c0_4] : memref<8x64xf32, #tpu.memory_space<vmem>>, vector<8x64xf32>
    tpu.vector_store %arg3[%c0_3, %c0_4], %3 {strides = array<i32>} : memref<8x64xf32, #tpu.memory_space<vmem>>, vector<8x64xf32>,
    return
  }
  func.func @transform_0(%arg0: i32) -> (i32, i32) {
    %c0_i32 = arith.constant 0 : i32
    %c0_i32_0 = arith.constant 0 : i32
    return %arg0, %c0_i32 : i32, i32
  }
  func.func @transform_1(%arg0: i32) -> (i32, i32) {
    %c0_i32 = arith.constant 0 : i32
    %c0_i32_0 = arith.constant 0 : i32
    return %arg0, %c0_i32 : i32, i32
  }
  func.func @transform_2(%arg0: i32) -> (i32, i32) {
    %c0_i32 = arith.constant 0 : i32
    %c0_i32_0 = arith.constant 0 : i32
    return %arg0, %c0_i32 : i32, i32
  }
}

</mosaic_0001>

<bundles_post_ra>
// kernel: tpu_custom_call.1
= control target key start
LH: loop header
LB: loop body
LE: loop exit
PB: predicated region body
PF: predicated region fallthrough
CT: control target
= control target key end

     0   :  { %7 = vsyncpa [#allocation3], 0  ;;  %s194_s0 = inlined_call_operand.hbm [shape: f32[8,32], index: 0, kind: input, shape index: {}]   ;;  %s195_s1 = inlined_call_operand.hbm [shape: f32[8,64], index: 1, kind: input, shape index: {}]   ;;  %s196_s2 = inlined_call_operand.hbm [shape: f32[8,64], index: 2, kind: output, shape index: {}]  }
   0x1   :  { %8 = vsyncpa [#allocation6], 0 }
   0x2   :  { %9 = vsyncpa [#allocation4], 0  ;;  %s139_s9 = smov [#allocation2]   ;;  %s140_s11 = smov [#allocation5]  }
   0x3   :  { %s16_s10 = sshll.u32 %s139_s9, 4  ;;  %s26_s12 = sshll.u32 %s140_s11, 4  ;;  %s17_s10 = int_to_ptr.vmem [resolvable:$true] %s16_s10  ;;  %s27_s12 = int_to_ptr.vmem [resolvable:$true] %s26_s12 }
   0x4   :  { %s67_s15 = scalar_lea.hbm %s194_s0, 128 }
   0x5   :  { %p68_p0 = scmp.ne.s32.totalorder %s194_s0, %s67_s15  ;;  %p71_p1 = scmp.lt.u32.totalorder %s67_s15, %s194_s0 }
   0x7   :  { %p73_p2 = pnand %p71_p1, %p68_p0 }
   0x9   :  { %76 = shalt.err (!%p73_p2)
}
   0xa   :  { %s77_s20 = scalar_lea.vmem %s17_s10, 128  ;;  %p82_p4 = scmp.lt.s32.totalorder %s17_s10, %s17_s10 }
   0xb   :  { %p78_p3 = scmp.ne.s32.totalorder %s17_s10, %s77_s20  ;;  %p83_p5 = scmp.lt.s32.totalorder %s77_s20, %s77_s20 }
   0xd   :  { %p84_p6 = por %p83_p5, %p82_p4 }
   0xf   :  { %p85_p7 = pnand %p84_p6, %p78_p3 }
  0x11   :  { %88 = shalt.err (!%p85_p7)
}
  0x12   :  { %19 = dma.hbm_to_vmem [thread:$0]  %s194_s0, 128, %s17_s10, [#allocation3]  }
  0x13   :  { %s89_s25 = scalar_lea.hbm %s195_s1, 128 }
  0x14   :  { %p90_p8 = scmp.ne.s32.totalorder %s195_s1, %s89_s25  ;;  %p93_p9 = scmp.lt.u32.totalorder %s89_s25, %s195_s1 }
  0x16   :  { %p95_p10 = pnand %p93_p9, %p90_p8 }
  0x18   :  { %98 = shalt.err (!%p95_p10)
}
  0x19   :  { %s99_s30 = scalar_lea.vmem %s27_s12, 128  ;;  %p104_p12 = scmp.lt.s32.totalorder %s27_s12, %s27_s12 }
  0x1a   :  { %p100_p11 = scmp.ne.s32.totalorder %s27_s12, %s99_s30  ;;  %p105_p13 = scmp.lt.s32.totalorder %s99_s30, %s99_s30 }
  0x1c   :  { %p106_p0 = por %p105_p13, %p104_p12 }
  0x1e   :  { %p107_p1 = pnand %p106_p0, %p100_p11 }
  0x20   :  { %110 = shalt.err (!%p107_p1)
}
  0x21   :  { %29 = dma.hbm_to_vmem [thread:$0]  %s195_s1, 128, %s27_s12, [#allocation6]  }
  0x22   :  { %133 = dma.done.wait [#allocation3], 128  }
  0x23   :  { %134 = vsyncadd [#allocation3], 4294967168 }
  0x24   :  { %135 = dma.done.wait [#allocation6], 128  }
  0x25   :  { %136 = vsyncadd [#allocation6], 4294967168  ;;  %v36_v0 = vld [vmem:[#allocation2] sm:$0xff]  ;;  %s141_s4 = smov 32   ;;  %vm41_vm0 = vcmask 261120   ;;  %v43_v1 = vld [vmem:[#allocation5] sm:$0xff] }
  0x26   :  { %38 = vrot.lane.b32.xlu0 %v36_v0, %s141_s4  ;;  %s142_s5 = smov [#allocation7]   ;;  %vm45_vm1 = vcmask 523264  }
  0x27   :  { %s53_s6 = sshll.u32 %s142_s5, 4  ;;  %s54_s6 = int_to_ptr.vmem [resolvable:$true] %s53_s6 }
  0x28   :  { %s111_s7 = scalar_lea.vmem %s54_s6, 128  ;;  %p116_p3 = scmp.lt.s32.totalorder %s54_s6, %s54_s6 }
  0x29   :  { %p112_p2 = scmp.ne.s32.totalorder %s54_s6, %s111_s7  ;;  %p117_p4 = scmp.lt.s32.totalorder %s111_s7, %s111_s7 }
  0x2b   :  { %p118_p5 = por %p117_p4, %p116_p3 }
  0x2d   :  { %p119_p6 = pnand %p118_p5, %p112_p2 }
  0x98   :  { %v39_v2 = vpop.permute.xlu0 %38 }
  0x99   :  { %v42_v3 = vsel %vm41_vm0, %v36_v0, %v39_v2 }
  0x9a   :  { %v44_v4 = vadd.f32 %v43_v1, %v42_v3 }
  0x9c   :  { %46 = vst.msk [vmem:[#allocation7] sm:$0xff] %vm45_vm1, %v44_v4 }
  0x9d   :  { %122 = shalt.err (!%p119_p6)
}
  0x9e   :  { %s123_s9 = scalar_lea.hbm %s196_s2, 128 }
  0x9f   :  { %p124_p7 = scmp.ne.s32.totalorder %s196_s2, %s123_s9  ;;  %p127_p8 = scmp.lt.u32.totalorder %s123_s9, %s196_s2 }
  0xa1   :  { %p129_p9 = pnand %p127_p8, %p124_p7 }
  0xa3   :  { %132 = shalt.err (!%p129_p9)
}
  0xa4   :  { %56 = dma.vmem_to_hbm [thread:$0]  %s54_s6, 128, %s196_s2, [#allocation4]  }
  0xa5   :  { %137 = dma.done.wait [#allocation4], 128  }
  0xa6   :  { %138 = vsyncadd [#allocation4], 4294967168 }
  0xa7   :  { %60 = vsyncpa [#allocation3], 1 }
  0xa8   :  { %61 = vsyncpa [#allocation6], 1 }
  0xa9   :  { %62 = vsyncpa [#allocation4], 1 }

</bundles_post_ra>
